<compile_context>
chip_gen: v7x
topology: tpu7x:2x2x1
jax: 0.10.0
libtpu: 0.0.40
codegen_flags: <defaults>
</compile_context>

<pallas_src>
import jax
import jax.numpy as jnp
from jax.experimental import pallas as pl
from jax.experimental.pallas import tpu as pltpu

_LANES = 128      # native lane width  -> lane-dense output slab
_SUBLANES = 8     # native sublane count -> padded batch tile


def _fused_kernel(wid_ref, sid_ref,                 # scalar prefetch ids (SMEM)
                  word_ref, seg_ref, pos0_ref,      # embedding tables (VMEM)
                  wp_ref, bp_ref,                   # pooler weights
                  wdp_ref, bdp_ref,                 # lane-padded classifier
                  out_ref,                          # (Bp, 128) output slab
                  cls_scr):                         # (Bp, H) VMEM scratch
    b_pad = cls_scr.shape[0]

    # ---- fused CLS-token embedding gather: word[id] + seg[id] + pos[0] ----
    pos0 = pos0_ref[...]                                        # (1, H)
    for b in range(b_pad):                                      # static unroll (b_pad == 8)
        w = wid_ref[b]
        s = sid_ref[b]
        cls_scr[pl.ds(b, 1), :] = (
            word_ref[pl.ds(w, 1), :] + seg_ref[pl.ds(s, 1), :] + pos0
        )
    cls = cls_scr[...]                                          # (Bp, H) f32

    # ---- BERT pooler: tanh(cls @ Wp + bp)   (MXU matmul, EUP tanh) ----
    pooled = jnp.tanh(
        jnp.dot(cls, wp_ref[...], preferred_element_type=jnp.float32) + bp_ref[...]
    )
    # dropout (eval mode) == identity

    # ---- classifier: weights pre-padded so logits land in lanes [H, H+P) ----
    logits_pad = (
        jnp.dot(pooled, wdp_ref[...], preferred_element_type=jnp.float32) + bdp_ref[...]
    )                                                           # (Bp, 128 - H)

    # ---- F.normalize(pooled, dim=-1): x * rsqrt(max(sum x^2, eps^2)), eps = 1e-12 ----
    sumsq = jnp.sum(pooled * pooled, axis=-1, keepdims=True)
    inv_norm = jax.lax.rsqrt(jnp.maximum(sumsq, 1e-24))
    feat = pooled * inv_norm                                    # (Bp, H)

    # ---- single unmasked, lane-dense store: [feat | logits | zero pad] ----
    out_ref[...] = jnp.concatenate([feat, logits_pad], axis=-1).astype(out_ref.dtype)


def bert_pt_hcl_head(cls_word_ids, cls_seg_ids, word_emb, seg_emb, pos0,
                     w_pool, b_pool, w_dense_pad, b_dense_pad):
    b_pad = cls_word_ids.shape[0]
    bert_dim = word_emb.shape[1]

    def full(shape):
        # whole-array block; index_map gets (grid idx, *scalar-prefetch refs)
        return pl.BlockSpec(shape, lambda i, wid, sid: (0,) * len(shape))

    grid_spec = pltpu.PrefetchScalarGridSpec(
        num_scalar_prefetch=2,          # cls_word_ids, cls_seg_ids -> SMEM
        grid=(1,),
        in_specs=[
            full(word_emb.shape),
            full(seg_emb.shape),
            full(pos0.shape),
            full(w_pool.shape),
            full(b_pool.shape),
            full(w_dense_pad.shape),
            full(b_dense_pad.shape),
        ],
        out_specs=full((b_pad, _LANES)),
        scratch_shapes=[pltpu.VMEM((b_pad, bert_dim), jnp.float32)],
    )
    return pl.pallas_call(
        _fused_kernel,
        grid_spec=grid_spec,
        out_shape=jax.ShapeDtypeStruct((b_pad, _LANES), jnp.float32),
    )(cls_word_ids, cls_seg_ids, word_emb, seg_emb, pos0,
      w_pool, b_pool, w_dense_pad, b_dense_pad)


@jax.jit
def bert_pt_hcl_forward(params, text_bert_indices, bert_segments_ids):
    B = text_bert_indices.shape[0]
    H = params["w_pool"].shape[0]
    P = params["w_dense"].shape[1]
    b_pad = ((B + _SUBLANES - 1) // _SUBLANES) * _SUBLANES

    # Only the CLS token (sequence position 0) feeds the pooler / classifier:
    # never materialize the (B, S, H) embedding tensor, just its row-0 ids
    # (padded with id 0 up to the 8-sublane batch tile).
    cls_word_ids = jnp.pad(text_bert_indices[:, 0].astype(jnp.int32), (0, b_pad - B))
    cls_seg_ids = jnp.pad(bert_segments_ids[:, 0].astype(jnp.int32), (0, b_pad - B))
    pos0 = params["pos_emb"][0:1, :]                            # (1, H)

    out = bert_pt_hcl_head(
        cls_word_ids, cls_seg_ids,
        params["word_emb"], params["seg_emb"], pos0,
        params["w_pool"], params["b_pool"],
        params["w_dense_pad"], params["b_dense_pad"],
    )
    feat = out[:B, :H]                 # normalized pooled feature
    logits = out[:B, H:H + P]
    return logits, feat.reshape(B, 1, H)


def init_params(key, vocab=64, max_seq=16, bert_dim=32, polarities_dim=3):
    assert bert_dim + polarities_dim <= _LANES
    ks = jax.random.split(key, 8)
    scale = 0.02
    w_dense = scale * jax.random.normal(ks[4], (bert_dim, polarities_dim), jnp.float32)
    b_dense = jnp.zeros((1, polarities_dim), jnp.float32)
    # lane-padded copies so the kernel writes one dense (b_pad, 128) output slab:
    #   out lanes [0, H) = normalized feature, [H, H+P) = logits, rest zero.
    pad_cols = _LANES - bert_dim
    w_dense_pad = jnp.zeros((bert_dim, pad_cols), jnp.float32).at[:, :polarities_dim].set(w_dense)
    b_dense_pad = jnp.zeros((1, pad_cols), jnp.float32).at[:, :polarities_dim].set(b_dense)
    params = {
        "word_emb": scale * jax.random.normal(ks[0], (vocab, bert_dim), jnp.float32),
        "seg_emb": scale * jax.random.normal(ks[1], (2, bert_dim), jnp.float32),
        "pos_emb": scale * jax.random.normal(ks[2], (max_seq, bert_dim), jnp.float32),
        "w_pool": scale * jax.random.normal(ks[3], (bert_dim, bert_dim), jnp.float32),
        "b_pool": jnp.zeros((1, bert_dim), jnp.float32),
        "w_dense": w_dense,
        "b_dense": b_dense,
        "w_dense_pad": w_dense_pad,
        "b_dense_pad": b_dense_pad,
        # mlp1 / mlp2 exist on the module but are unused in forward (parity only)
        "w_mlp1": scale * jax.random.normal(ks[5], (bert_dim, bert_dim), jnp.float32),
        "b_mlp1": jnp.zeros((bert_dim,), jnp.float32),
        "w_mlp2": scale * jax.random.normal(ks[6], (bert_dim, bert_dim), jnp.float32),
        "b_mlp2": jnp.zeros((bert_dim,), jnp.float32),
    }
    return params


def reference_forward(params, text_bert_indices, bert_segments_ids):
    # plain-JAX reference of the same (synthetic-backbone) forward
    cls = (params["word_emb"][text_bert_indices[:, 0]]
           + params["seg_emb"][bert_segments_ids[:, 0]]
           + params["pos_emb"][0][None, :])
    pooled = jnp.tanh(cls @ params["w_pool"] + params["b_pool"])
    logits = pooled @ params["w_dense"] + params["b_dense"]
    nrm = jnp.sqrt(jnp.sum(pooled * pooled, axis=-1, keepdims=True))
    feat = pooled / jnp.maximum(nrm, 1e-12)
    return logits, feat[:, None, :]


if __name__ == "__main__":
    # TODO(synk): the real pretrained BERT encoder is not reproduced here; the
    # backbone is a synthetic embedding-sum + pooler with identical interfaces.
    B, S, H, P, V = 2, 8, 32, 3, 64

    key = jax.random.PRNGKey(0)
    kp, kx = jax.random.split(key)
    params = init_params(kp, vocab=V, max_seq=16, bert_dim=H, polarities_dim=P)

    k1, k2 = jax.random.split(kx)
    text_bert_indices = jax.random.randint(k1, (B, S), 0, V, dtype=jnp.int32)
    bert_segments_ids = jax.random.randint(k2, (B, S), 0, 2, dtype=jnp.int32)

    logits, pooled_feature = bert_pt_hcl_forward(
        params, text_bert_indices, bert_segments_ids
    )
    jax.block_until_ready((logits, pooled_feature))

    assert logits.shape == (B, P)
    assert pooled_feature.shape == (B, 1, H)

    # normalized feature rows must have unit L2 norm
    norms = jnp.sqrt(jnp.sum(pooled_feature[:, 0, :] ** 2, axis=-1))
    assert bool(jnp.all(jnp.abs(norms - 1.0) < 1e-4))

    # kernel must match the plain-JAX reference
    ref_logits, ref_feat = reference_forward(params, text_bert_indices, bert_segments_ids)
    assert bool(jnp.allclose(logits, ref_logits, atol=1e-4, rtol=1e-4))
    assert bool(jnp.allclose(pooled_feature, ref_feat, atol=1e-4, rtol=1e-4))

    print("KERNEL_OK")
</pallas_src>

<mosaic_0001>
module attributes {stable_mosaic.version = 11 : i64} {
  func.func @_fused_kernel(%arg0: i32, %arg1: memref<8xi32, #tpu.memory_space<smem>>, %arg2: memref<8xi32, #tpu.memory_space<smem>>, %arg3: memref<64x32xf32, #tpu.memory_space<vmem>>, %arg4: memref<2x32xf32, #tpu.memory_space<vmem>>, %arg5: memref<1x32xf32, #tpu.memory_space<vmem>>, %arg6: memref<32x32xf32, #tpu.memory_space<vmem>>, %arg7: memref<1x32xf32, #tpu.memory_space<vmem>>, %arg8: memref<32x96xf32, #tpu.memory_space<vmem>>, %arg9: memref<1x96xf32, #tpu.memory_space<vmem>>, %arg10: memref<8x128xf32, #tpu.memory_space<vmem>>, %arg11: memref<8x32xf32, #tpu.memory_space<vmem>>) attributes {dimension_semantics = [#tpu.dimension_semantics<arbitrary>], iteration_bounds = array<i64: 1>, scalar_prefetch = 2 : i64, scratch_operands = 1 : i64, tpu.core_type = #tpu.core_type<tc>, window_params = [{pipeline_mode = #tpu.pipeline_mode<synchronous>, transform_indices = @transform_0, window_bounds = array<i64: 64, 32>}, {pipeline_mode = #tpu.pipeline_mode<synchronous>, transform_indices = @transform_1, window_bounds = array<i64: 2, 32>}, {pipeline_mode = #tpu.pipeline_mode<synchronous>, transform_indices = @transform_2, window_bounds = array<i64: 1, 32>}, {pipeline_mode = #tpu.pipeline_mode<synchronous>, transform_indices = @transform_3, window_bounds = array<i64: 32, 32>}, {pipeline_mode = #tpu.pipeline_mode<synchronous>, transform_indices = @transform_4, window_bounds = array<i64: 1, 32>}, {pipeline_mode = #tpu.pipeline_mode<synchronous>, transform_indices = @transform_5, window_bounds = array<i64: 32, 96>}, {pipeline_mode = #tpu.pipeline_mode<synchronous>, transform_indices = @transform_6, window_bounds = array<i64: 1, 96>}, {pipeline_mode = #tpu.pipeline_mode<synchronous>, transform_indices = @transform_7, window_bounds = array<i64: 8, 128>}]} {
    %c0 = arith.constant 0 : index
    %c0_0 = arith.constant 0 : index
    %0 = vector.load %arg5[%c0, %c0_0] : memref<1x32xf32, #tpu.memory_space<vmem>>, vector<1x32xf32>
    %c0_1 = arith.constant 0 : index
    %1 = memref.load %arg1[%c0_1] : memref<8xi32, #tpu.memory_space<smem>>
    %c0_2 = arith.constant 0 : index
    %2 = memref.load %arg2[%c0_2] : memref<8xi32, #tpu.memory_space<smem>>
    %3 = arith.index_cast %1 : i32 to index
    %c0_3 = arith.constant 0 : index
    %4 = vector.load %arg3[%3, %c0_3] : memref<64x32xf32, #tpu.memory_space<vmem>>, vector<1x32xf32>
    %5 = arith.index_cast %2 : i32 to index
    %c0_4 = arith.constant 0 : index
    %6 = vector.load %arg4[%5, %c0_4] : memref<2x32xf32, #tpu.memory_space<vmem>>, vector<1x32xf32>
    %7 = arith.addf %4, %6 : vector<1x32xf32>
    %8 = arith.addf %7, %0 : vector<1x32xf32>
    %c0_5 = arith.constant 0 : index
    %c0_6 = arith.constant 0 : index
    %9 = vector.load %arg11[%c0_5, %c0_6] : memref<8x32xf32, #tpu.memory_space<vmem>>, vector<1x32xf32>
    tpu.vector_store %arg11[%c0_5, %c0_6], %8 {strides = array<i32>} : memref<8x32xf32, #tpu.memory_space<vmem>>, vector<1x32xf32>,
    %c1 = arith.constant 1 : index
    %10 = memref.load %arg1[%c1] : memref<8xi32, #tpu.memory_space<smem>>
    %c1_7 = arith.constant 1 : index
    %11 = memref.load %arg2[%c1_7] : memref<8xi32, #tpu.memory_space<smem>>
    %12 = arith.index_cast %10 : i32 to index
    %c0_8 = arith.constant 0 : index
    %13 = vector.load %arg3[%12, %c0_8] : memref<64x32xf32, #tpu.memory_space<vmem>>, vector<1x32xf32>
    %14 = arith.index_cast %11 : i32 to index
    %c0_9 = arith.constant 0 : index
    %15 = vector.load %arg4[%14, %c0_9] : memref<2x32xf32, #tpu.memory_space<vmem>>, vector<1x32xf32>
    %16 = arith.addf %13, %15 : vector<1x32xf32>
    %17 = arith.addf %16, %0 : vector<1x32xf32>
    %c1_10 = arith.constant 1 : index
    %c0_11 = arith.constant 0 : index
    %18 = vector.load %arg11[%c1_10, %c0_11] : memref<8x32xf32, #tpu.memory_space<vmem>>, vector<1x32xf32>
    tpu.vector_store %arg11[%c1_10, %c0_11], %17 {strides = array<i32>} : memref<8x32xf32, #tpu.memory_space<vmem>>, vector<1x32xf32>,
    %c2 = arith.constant 2 : index
    %19 = memref.load %arg1[%c2] : memref<8xi32, #tpu.memory_space<smem>>
    %c2_12 = arith.constant 2 : index
    %20 = memref.load %arg2[%c2_12] : memref<8xi32, #tpu.memory_space<smem>>
    %21 = arith.index_cast %19 : i32 to index
    %c0_13 = arith.constant 0 : index
    %22 = vector.load %arg3[%21, %c0_13] : memref<64x32xf32, #tpu.memory_space<vmem>>, vector<1x32xf32>
    %23 = arith.index_cast %20 : i32 to index
    %c0_14 = arith.constant 0 : index
    %24 = vector.load %arg4[%23, %c0_14] : memref<2x32xf32, #tpu.memory_space<vmem>>, vector<1x32xf32>
    %25 = arith.addf %22, %24 : vector<1x32xf32>
    %26 = arith.addf %25, %0 : vector<1x32xf32>
    %c2_15 = arith.constant 2 : index
    %c0_16 = arith.constant 0 : index
    %27 = vector.load %arg11[%c2_15, %c0_16] : memref<8x32xf32, #tpu.memory_space<vmem>>, vector<1x32xf32>
    tpu.vector_store %arg11[%c2_15, %c0_16], %26 {strides = array<i32>} : memref<8x32xf32, #tpu.memory_space<vmem>>, vector<1x32xf32>,
    %c3 = arith.constant 3 : index
    %28 = memref.load %arg1[%c3] : memref<8xi32, #tpu.memory_space<smem>>
    %c3_17 = arith.constant 3 : index
    %29 = memref.load %arg2[%c3_17] : memref<8xi32, #tpu.memory_space<smem>>
    %30 = arith.index_cast %28 : i32 to index
    %c0_18 = arith.constant 0 : index
    %31 = vector.load %arg3[%30, %c0_18] : memref<64x32xf32, #tpu.memory_space<vmem>>, vector<1x32xf32>
    %32 = arith.index_cast %29 : i32 to index
    %c0_19 = arith.constant 0 : index
    %33 = vector.load %arg4[%32, %c0_19] : memref<2x32xf32, #tpu.memory_space<vmem>>, vector<1x32xf32>
    %34 = arith.addf %31, %33 : vector<1x32xf32>
    %35 = arith.addf %34, %0 : vector<1x32xf32>
    %c3_20 = arith.constant 3 : index
    %c0_21 = arith.constant 0 : index
    %36 = vector.load %arg11[%c3_20, %c0_21] : memref<8x32xf32, #tpu.memory_space<vmem>>, vector<1x32xf32>
    tpu.vector_store %arg11[%c3_20, %c0_21], %35 {strides = array<i32>} : memref<8x32xf32, #tpu.memory_space<vmem>>, vector<1x32xf32>,
    %c4 = arith.constant 4 : index
    %37 = memref.load %arg1[%c4] : memref<8xi32, #tpu.memory_space<smem>>
    %c4_22 = arith.constant 4 : index
    %38 = memref.load %arg2[%c4_22] : memref<8xi32, #tpu.memory_space<smem>>
    %39 = arith.index_cast %37 : i32 to index
    %c0_23 = arith.constant 0 : index
    %40 = vector.load %arg3[%39, %c0_23] : memref<64x32xf32, #tpu.memory_space<vmem>>, vector<1x32xf32>
    %41 = arith.index_cast %38 : i32 to index
    %c0_24 = arith.constant 0 : index
    %42 = vector.load %arg4[%41, %c0_24] : memref<2x32xf32, #tpu.memory_space<vmem>>, vector<1x32xf32>
    %43 = arith.addf %40, %42 : vector<1x32xf32>
    %44 = arith.addf %43, %0 : vector<1x32xf32>
    %c4_25 = arith.constant 4 : index
    %c0_26 = arith.constant 0 : index
    %45 = vector.load %arg11[%c4_25, %c0_26] : memref<8x32xf32, #tpu.memory_space<vmem>>, vector<1x32xf32>
    tpu.vector_store %arg11[%c4_25, %c0_26], %44 {strides = array<i32>} : memref<8x32xf32, #tpu.memory_space<vmem>>, vector<1x32xf32>,
    %c5 = arith.constant 5 : index
    %46 = memref.load %arg1[%c5] : memref<8xi32, #tpu.memory_space<smem>>
    %c5_27 = arith.constant 5 : index
    %47 = memref.load %arg2[%c5_27] : memref<8xi32, #tpu.memory_space<smem>>
    %48 = arith.index_cast %46 : i32 to index
    %c0_28 = arith.constant 0 : index
    %49 = vector.load %arg3[%48, %c0_28] : memref<64x32xf32, #tpu.memory_space<vmem>>, vector<1x32xf32>
    %50 = arith.index_cast %47 : i32 to index
    %c0_29 = arith.constant 0 : index
    %51 = vector.load %arg4[%50, %c0_29] : memref<2x32xf32, #tpu.memory_space<vmem>>, vector<1x32xf32>
    %52 = arith.addf %49, %51 : vector<1x32xf32>
    %53 = arith.addf %52, %0 : vector<1x32xf32>
    %c5_30 = arith.constant 5 : index
    %c0_31 = arith.constant 0 : index
    %54 = vector.load %arg11[%c5_30, %c0_31] : memref<8x32xf32, #tpu.memory_space<vmem>>, vector<1x32xf32>
    tpu.vector_store %arg11[%c5_30, %c0_31], %53 {strides = array<i32>} : memref<8x32xf32, #tpu.memory_space<vmem>>, vector<1x32xf32>,
    %c6 = arith.constant 6 : index
    %55 = memref.load %arg1[%c6] : memref<8xi32, #tpu.memory_space<smem>>
    %c6_32 = arith.constant 6 : index
    %56 = memref.load %arg2[%c6_32] : memref<8xi32, #tpu.memory_space<smem>>
    %57 = arith.index_cast %55 : i32 to index
    %c0_33 = arith.constant 0 : index
    %58 = vector.load %arg3[%57, %c0_33] : memref<64x32xf32, #tpu.memory_space<vmem>>, vector<1x32xf32>
    %59 = arith.index_cast %56 : i32 to index
    %c0_34 = arith.constant 0 : index
    %60 = vector.load %arg4[%59, %c0_34] : memref<2x32xf32, #tpu.memory_space<vmem>>, vector<1x32xf32>
    %61 = arith.addf %58, %60 : vector<1x32xf32>
    %62 = arith.addf %61, %0 : vector<1x32xf32>
    %c6_35 = arith.constant 6 : index
    %c0_36 = arith.constant 0 : index
    %63 = vector.load %arg11[%c6_35, %c0_36] : memref<8x32xf32, #tpu.memory_space<vmem>>, vector<1x32xf32>
    tpu.vector_store %arg11[%c6_35, %c0_36], %62 {strides = array<i32>} : memref<8x32xf32, #tpu.memory_space<vmem>>, vector<1x32xf32>,
    %c7 = arith.constant 7 : index
    %64 = memref.load %arg1[%c7] : memref<8xi32, #tpu.memory_space<smem>>
    %c7_37 = arith.constant 7 : index
    %65 = memref.load %arg2[%c7_37] : memref<8xi32, #tpu.memory_space<smem>>
    %66 = arith.index_cast %64 : i32 to index
    %c0_38 = arith.constant 0 : index
    %67 = vector.load %arg3[%66, %c0_38] : memref<64x32xf32, #tpu.memory_space<vmem>>, vector<1x32xf32>
    %68 = arith.index_cast %65 : i32 to index
    %c0_39 = arith.constant 0 : index
    %69 = vector.load %arg4[%68, %c0_39] : memref<2x32xf32, #tpu.memory_space<vmem>>, vector<1x32xf32>
    %70 = arith.addf %67, %69 : vector<1x32xf32>
    %71 = arith.addf %70, %0 : vector<1x32xf32>
    %c7_40 = arith.constant 7 : index
    %c0_41 = arith.constant 0 : index
    %72 = vector.load %arg11[%c7_40, %c0_41] : memref<8x32xf32, #tpu.memory_space<vmem>>, vector<1x32xf32>
    tpu.vector_store %arg11[%c7_40, %c0_41], %71 {strides = array<i32>} : memref<8x32xf32, #tpu.memory_space<vmem>>, vector<1x32xf32>,
    %c0_42 = arith.constant 0 : index
    %c0_43 = arith.constant 0 : index
    %73 = vector.load %arg11[%c0_42, %c0_43] : memref<8x32xf32, #tpu.memory_space<vmem>>, vector<8x32xf32>
    %c0_44 = arith.constant 0 : index
    %c0_45 = arith.constant 0 : index
    %74 = vector.load %arg6[%c0_44, %c0_45] : memref<32x32xf32, #tpu.memory_space<vmem>>, vector<32x32xf32>
    %cst = arith.constant dense<0.000000e+00> : vector<8x32xf32>
    %75 = tpu.matmul %73, %74, %cst {dimension_numbers = #tpu.dot_dimension_numbers<[1], [0], [0], [1], [0, 0, 1, 1], [], []>} : vector<8x32xf32>, vector<32x32xf32>, vector<8x32xf32> -> vector<8x32xf32>
    %c0_46 = arith.constant 0 : index
    %c0_47 = arith.constant 0 : index
    %76 = vector.load %arg7[%c0_46, %c0_47] : memref<1x32xf32, #tpu.memory_space<vmem>>, vector<1x32xf32>
    %77 = vector.broadcast %76 : vector<1x32xf32> to vector<8x32xf32>
    %78 = arith.addf %75, %77 : vector<8x32xf32>
    %79 = math.tanh %78 : vector<8x32xf32>
    %c0_48 = arith.constant 0 : index
    %c0_49 = arith.constant 0 : index
    %80 = vector.load %arg8[%c0_48, %c0_49] : memref<32x96xf32, #tpu.memory_space<vmem>>, vector<32x96xf32>
    %cst_50 = arith.constant dense<0.000000e+00> : vector<8x96xf32>
    %81 = tpu.matmul %79, %80, %cst_50 {dimension_numbers = #tpu.dot_dimension_numbers<[1], [0], [0], [1], [0, 0, 1, 1], [], []>} : vector<8x32xf32>, vector<32x96xf32>, vector<8x96xf32> -> vector<8x96xf32>
    %c0_51 = arith.constant 0 : index
    %c0_52 = arith.constant 0 : index
    %82 = vector.load %arg9[%c0_51, %c0_52] : memref<1x96xf32, #tpu.memory_space<vmem>>, vector<1x96xf32>
    %83 = vector.broadcast %82 : vector<1x96xf32> to vector<8x96xf32>
    %84 = arith.addf %81, %83 : vector<8x96xf32>
    %85 = arith.mulf %79, %79 : vector<8x32xf32>
    %cst_53 = arith.constant dense<0.000000e+00> : vector<8xf32>
    %86 = vector.multi_reduction <add>, %85, %cst_53 [1] : vector<8x32xf32> to vector<8xf32>
    %87 = vector.shape_cast %86 : vector<8xf32> to vector<8x1xf32>
    %cst_54 = arith.constant 1.000000e-24 : f32
    %88 = vector.broadcast %cst_54 : f32 to vector<8x1xf32>
    %89 = arith.maximumf %87, %88 : vector<8x1xf32>
    %90 = math.rsqrt %89 : vector<8x1xf32>
    %91 = vector.broadcast %90 : vector<8x1xf32> to vector<8x32xf32>
    %92 = arith.mulf %79, %91 : vector<8x32xf32>
    %93 = tpu.concatenate %92, %84 in 1 : vector<8x32xf32>, vector<8x96xf32> -> vector<8x128xf32>
    %c0_55 = arith.constant 0 : index
    %c0_56 = arith.constant 0 : index
    %94 = vector.load %arg10[%c0_55, %c0_56] : memref<8x128xf32, #tpu.memory_space<vmem>>, vector<8x128xf32>
    tpu.vector_store %arg10[%c0_55, %c0_56], %93 {strides = array<i32>} : memref<8x128xf32, #tpu.memory_space<vmem>>, vector<8x128xf32>,
    return
  }
  func.func @transform_0(%arg0: i32, %arg1: memref<8xi32, #tpu.memory_space<smem>>, %arg2: memref<8xi32, #tpu.memory_space<smem>>) -> (i32, i32) {
    %c0_i32 = arith.constant 0 : i32
    %c0_i32_0 = arith.constant 0 : i32
    %c0_i32_1 = arith.constant 0 : i32
    return %c0_i32, %c0_i32_0 : i32, i32
  }
  func.func @transform_1(%arg0: i32, %arg1: memref<8xi32, #tpu.memory_space<smem>>, %arg2: memref<8xi32, #tpu.memory_space<smem>>) -> (i32, i32) {
    %c0_i32 = arith.constant 0 : i32
    %c0_i32_0 = arith.constant 0 : i32
    %c0_i32_1 = arith.constant 0 : i32
    return %c0_i32, %c0_i32_0 : i32, i32
  }
  func.func @transform_2(%arg0: i32, %arg1: memref<8xi32, #tpu.memory_space<smem>>, %arg2: memref<8xi32, #tpu.memory_space<smem>>) -> (i32, i32) {
    %c0_i32 = arith.constant 0 : i32
    %c0_i32_0 = arith.constant 0 : i32
    %c0_i32_1 = arith.constant 0 : i32
    return %c0_i32, %c0_i32_0 : i32, i32
  }
  func.func @transform_3(%arg0: i32, %arg1: memref<8xi32, #tpu.memory_space<smem>>, %arg2: memref<8xi32, #tpu.memory_space<smem>>) -> (i32, i32) {
    %c0_i32 = arith.constant 0 : i32
    %c0_i32_0 = arith.constant 0 : i32
    %c0_i32_1 = arith.constant 0 : i32
    return %c0_i32, %c0_i32_0 : i32, i32
  }
  func.func @transform_4(%arg0: i32, %arg1: memref<8xi32, #tpu.memory_space<smem>>, %arg2: memref<8xi32, #tpu.memory_space<smem>>) -> (i32, i32) {
    %c0_i32 = arith.constant 0 : i32
    %c0_i32_0 = arith.constant 0 : i32
    %c0_i32_1 = arith.constant 0 : i32
    return %c0_i32, %c0_i32_0 : i32, i32
  }
  func.func @transform_5(%arg0: i32, %arg1: memref<8xi32, #tpu.memory_space<smem>>, %arg2: memref<8xi32, #tpu.memory_space<smem>>) -> (i32, i32) {
    %c0_i32 = arith.constant 0 : i32
    %c0_i32_0 = arith.constant 0 : i32
    %c0_i32_1 = arith.constant 0 : i32
    return %c0_i32, %c0_i32_0 : i32, i32
  }
  func.func @transform_6(%arg0: i32, %arg1: memref<8xi32, #tpu.memory_space<smem>>, %arg2: memref<8xi32, #tpu.memory_space<smem>>) -> (i32, i32) {
    %c0_i32 = arith.constant 0 : i32
    %c0_i32_0 = arith.constant 0 : i32
    %c0_i32_1 = arith.constant 0 : i32
    return %c0_i32, %c0_i32_0 : i32, i32
  }
  func.func @transform_7(%arg0: i32, %arg1: memref<8xi32, #tpu.memory_space<smem>>, %arg2: memref<8xi32, #tpu.memory_space<smem>>) -> (i32, i32) {
    %c0_i32 = arith.constant 0 : i32
    %c0_i32_0 = arith.constant 0 : i32
    %c0_i32_1 = arith.constant 0 : i32
    return %c0_i32, %c0_i32_0 : i32, i32
  }
}

</mosaic_0001>

<bundles_post_ra>
// kernel: bert_pt_hcl_forward.1
= control target key start
LH: loop header
LB: loop body
LE: loop exit
PB: predicated region body
PF: predicated region fallthrough
CT: control target
= control target key end

     0   :  { %s585_s0 = inlined_call_operand.vmem [shape: s32[8], index: 0, kind: input, shape index: {}]   ;;  %s586_s2 = inlined_call_operand.vmem [shape: f32[64,32], index: 2, kind: input, shape index: {}]   ;;  %s587_s3 = inlined_call_operand.vmem [shape: f32[2,32], index: 3, kind: input, shape index: {}]   ;;  %s588_s4 = inlined_call_operand.vmem [shape: f32[1,32], index: 4, kind: input, shape index: {}]   ;;  %s589_s5 = inlined_call_operand.vmem [shape: f32[32,32], index: 5, kind: input, shape index: {}]   ;;  %s590_s6 = inlined_call_operand.vmem [shape: f32[1,32], index: 6, kind: input, shape index: {}]   ;;  %s591_s7 = inlined_call_operand.vmem [shape: f32[32,96], index: 7, kind: input, shape index: {}]   ;;  %s592_s8 = inlined_call_operand.vmem [shape: f32[1,96], index: 8, kind: input, shape index: {}]   ;;  %s593_s9 = inlined_call_operand.vmem [shape: f32[8,128], index: 9, kind: output, shape index: {}]   ;;  %s594_s1 = inlined_call_operand.vmem [shape: s32[8], index: 1, kind: input, shape index: {}]  }
   0x1   :  { %595 = sst [smem:[#allocation7_spill]] %s593_s9  ;;  %s14_s11 = sshll.u32 %s585_s0, 4  ;;  %s15_s11 = int_to_ptr.vmem [resolvable:$true] %s14_s11 }
   0x2   :  { %s18_s14 = sshll.u32 %s594_s1, 4  ;;  %s388_s15 = scalar_lea.vmem %s15_s11, 16  ;;  %s19_s14 = int_to_ptr.vmem [resolvable:$true] %s18_s14 }
   0x3   :  { %p389_p0 = scmp.ne.s32.totalorder %s15_s11, %s388_s15  ;;  %p393_p1 = scmp.lt.s32.totalorder %s15_s11, %s15_s11 }
   0x4   :  { %p394_p2 = scmp.lt.s32.totalorder %s388_s15, %s388_s15 }
   0x6   :  { %p395_p3 = por %p394_p2, %p393_p1 }
   0x8   :  { %p396_p4 = pnand %p395_p3, %p389_p0 }
   0xa   :  { %399 = shalt.err (!%p396_p4)  }
   0xb   :  { %s414_s16 = smov [#allocation4]   ;;  %s400_s17 = scalar_lea.vmem %s19_s14, 16 }
   0xc   :  { %17 = dma.vmem_to_smem %s15_s11, 16, %s414_s16, [#allocation3] }
   0xd   :  { %p401_p5 = scmp.ne.s32.totalorder %s19_s14, %s400_s17  ;;  %p405_p6 = scmp.lt.s32.totalorder %s19_s14, %s19_s14 }
   0xe   :  { %p406_p7 = scmp.lt.s32.totalorder %s400_s17, %s400_s17 }
  0x10   :  { %p407_p8 = por %p406_p7, %p405_p6 }
  0x12   :  { %p408_p9 = pnand %p407_p8, %p401_p5 }
  0x14   :  { %411 = shalt.err (!%p408_p9)  }
  0x15   :  { %s415_s0 = smov [#allocation5]  }
  0x16   :  { %21 = dma.vmem_to_smem %s19_s14, 16, %s415_s0, [#allocation3] }
  0x17   :  { %412 = dma.done.wait [#allocation3], 32 }
  0x18   :  { %413 = vsyncadd [#allocation3], 4294967264 }
  0x19   :  { %23 = sfence }
  0x1a   :  { %v113_v0 = vld [vmem:[%s589_s5] sm:$0xff]  ;;  %v114_v1 = vld [vmem:[%s589_s5 + $0x8] sm:$0xff]  ;;  %v115_v2 = vld [vmem:[%s589_s5 + $0x10] sm:$0xff]  ;;  %v416_v3 = vmov 0.0|0.0   ;;  %vm417_vm0 = vmmov 0   ;;  %v418_v6 = vmov 0.0  }
  0x1b   :  { %366 = vmatprep.subr.bf16.mxu0 %v416_v3  ;;  %v367_v4 = vpack.c.bf16 %v114_v1, %v113_v0  ;;  %v116_v5 = vld [vmem:[%s589_s5 + $0x18] sm:$0xff]  ;;  %352 = vmatprep.mubr.msk.f32.mxu0 %vm417_vm0, %v418_v6  ;;  %s39_s25 = sld [smem:[#allocation4]]  ;;  %s316_s27 = sld [smem:[#allocation4 + $0x1]]  ;;  %v38_v9 = vld [vmem:[%s588_s4] sm:$0x1]  ;;  %vm47_vm1 = vcmask 253952  }
  0x1c   :  { %s40_s26 = sld [smem:[#allocation5]]  ;;  %372 = vmatprep.subr.bf16.mxu1 %v416_v3  ;;  %363 = vmatprep.mubr.msk.f32.mxu1 %vm417_vm0, %v418_v6  ;;  %v370_v7 = vpack.c.bf16 %v116_v5, %v115_v2  ;;  %s317_s28 = sld [smem:[#allocation5 + $0x1]]  ;;  %vm124_vm2 = vcmask 261120   ;;  %v199_v42 = vld [vmem:[%s591_s7] sm:$0xff]  ;;  %v200_v43 = vld [vmem:[%s591_s7 + $0x8] sm:$0xff]  ;;  %v201_v44 = vld [vmem:[%s591_s7 + $0x10] sm:$0xff] }
  0x1d   :  { %368 = vmatpush3.bf16.msra.mxu0 %v367_v4  ;;  %s318_s29 = sld [smem:[#allocation4 + $0x2]]  ;;  %s320_s10 = sld [smem:[#allocation4 + $0x3]]  ;;  %v373_v45 = vpack.c.bf16 %v200_v43, %v199_v42  ;;  %v202_v46 = vld [vmem:[%s591_s7 + $0x18] sm:$0xff]  ;;  %v330_v48 = vld [vmem:[%s590_s6] ss:$0 sm:$0xff] }
  0x1e   :  { %369 = vmatprep.subr.bf16.mxu0 %v416_v3  ;;  %s319_s30 = sld [smem:[#allocation5 + $0x2]]  ;;  %s321_s11 = sld [smem:[#allocation5 + $0x3]]  ;;  %v376_v47 = vpack.c.bf16 %v202_v46, %v201_v44  ;;  %v332_v55 = vld [vmem:[%s592_s8] ss:$0 sm:$0xff] }
  0x1f   :  { %s322_s12 = sld [smem:[#allocation4 + $0x4]]  ;;  %s493_s13 = sld [smem:[#allocation4 + $0x5]]  ;;  %374 = vmatpush3.bf16.msra.mxu1 %v373_v45 }
  0x20   :  { %s491_s5 = sld [smem:[#allocation5 + $0x4]]  ;;  %s498_s17 = sld [smem:[#allocation5 + $0x5]]  ;;  %375 = vmatprep.subr.bf16.mxu1 %v416_v3 }
  0x21   :  { %371 = vmatpush3.bf16.msra.mxu0 %v370_v7  ;;  %s41_s16 = scalar_lea.vmem %s586_s2, %s39_s25  ;;  %s51_s21 = scalar_lea.vmem %s586_s2, %s316_s27 }
  0x22   :  { %v42_v8 = vld [vmem:[%s41_s16] sm:$0x1]  ;;  %s43_s18 = scalar_lea.vmem %s587_s3, %s40_s26  ;;  %s53_s25 = scalar_lea.vmem %s587_s3, %s317_s28 }
  0x23   :  { %v44_v10 = vld [vmem:[%s43_s18] sm:$0x1]  ;;  %s60_s9 = scalar_lea.vmem %s586_s2, %s318_s29  ;;  %s69_s18 = scalar_lea.vmem %s586_s2, %s320_s10  ;;  %377 = vmatpush3.bf16.msra.mxu1 %v376_v47 }
  0x24   :  { %v52_v11 = vld [vmem:[%s51_s21] sm:$0x1]  ;;  %v45_v12 = vadd.f32 %v44_v10, %v42_v8  ;;  %s62_s0 = scalar_lea.vmem %s587_s3, %s319_s30  ;;  %s71_s19 = scalar_lea.vmem %s587_s3, %s321_s11 }
  0x25   :  { %v54_v13 = vld [vmem:[%s53_s25] sm:$0x1]  ;;  %s87_s14 = scalar_lea.vmem %s586_s2, %s493_s13  ;;  %s326_s15 = sld [smem:[#allocation4 + $0x6]] }
  0x26   :  { %v61_v14 = vld [vmem:[%s60_s9] sm:$0x1]  ;;  %v55_v15 = vadd.f32 %v54_v13, %v52_v11  ;;  %s78_s9 = scalar_lea.vmem %s586_s2, %s322_s12  ;;  %v46_v18 = vadd.f32 %v45_v12, %v38_v9  ;;  %s80_s10 = scalar_lea.vmem %s587_s3, %s491_s5 }
  0x27   :  { %v63_v16 = vld [vmem:[%s62_s0] sm:$0x1]  ;;  %s89_s12 = scalar_lea.vmem %s587_s3, %s498_s17  ;;  %s327_s16 = sld [smem:[#allocation5 + $0x6]] }
  0x28   :  { %v70_v17 = vld [vmem:[%s69_s18] sm:$0x1]  ;;  %v64_v19 = vadd.f32 %v63_v16, %v61_v14  ;;  %v56_v22 = vadd.f32 %v55_v15, %v38_v9  ;;  %48 = vst.msk [vmem:[#allocation2] sm:$0x1] %vm47_vm1, %v46_v18  ;;  %s328_s5 = sld [smem:[#allocation4 + $0x7]] }
  0x29   :  { %v72_v20 = vld [vmem:[%s71_s19] sm:$0x1]  ;;  %s329_s13 = sld [smem:[#allocation5 + $0x7]] }
  0x2a   :  { %v79_v21 = vld [vmem:[%s78_s9] sm:$0x1]  ;;  %v73_v23 = vadd.f32 %v72_v20, %v70_v17  ;;  %v65_v26 = vadd.f32 %v64_v19, %v38_v9  ;;  %57 = vst.msk [vmem:[#allocation2 + $0x1] sm:$0x1] %vm47_vm1, %v56_v22 }
  0x2b   :  { %v81_v24 = vld [vmem:[%s80_s10] sm:$0x1]  ;;  %s96_s27 = scalar_lea.vmem %s586_s2, %s326_s15 }
  0x2c   :  { %v88_v25 = vld [vmem:[%s87_s14] sm:$0x1]  ;;  %v82_v27 = vadd.f32 %v81_v24, %v79_v21  ;;  %v74_v29 = vadd.f32 %v73_v23, %v38_v9  ;;  %66 = vst.msk [vmem:[#allocation2 + $0x2] sm:$0x1] %vm47_vm1, %v65_v26 }
  0x2d   :  { %v90_v28 = vld [vmem:[%s89_s12] sm:$0x1]  ;;  %s98_s1 = scalar_lea.vmem %s587_s3, %s327_s16  ;;  %s419_s12 = smov 32  }
  0x2e   :  { %v91_v30 = vadd.f32 %v90_v28, %v88_v25  ;;  %v83_v31 = vadd.f32 %v82_v27, %v38_v9  ;;  %75 = vst.msk [vmem:[#allocation2 + $0x3] sm:$0x1] %vm47_vm1, %v74_v29  ;;  %v97_v33 = vld [vmem:[%s96_s27] sm:$0x1]  ;;  %s105_s29 = scalar_lea.vmem %s586_s2, %s328_s5  ;;  %s596_s16 = sld [smem:[#allocation7_spill]] }
  0x2f   :  { %v99_v34 = vld [vmem:[%s98_s1] sm:$0x1]  ;;  %s107_s21 = scalar_lea.vmem %s587_s3, %s329_s13 }
  0x30   :  { %v92_v32 = vadd.f32 %v91_v30, %v38_v9  ;;  %84 = vst.msk [vmem:[#allocation2 + $0x4] sm:$0x1] %vm47_vm1, %v83_v31  ;;  %v106_v35 = vld [vmem:[%s105_s29] sm:$0x1]  ;;  %v100_v36 = vadd.f32 %v99_v34, %v97_v33 }
  0x31   :  { %v108_v37 = vld [vmem:[%s107_s21] sm:$0x1] }
  0x32   :  { %93 = vst.msk [vmem:[#allocation2 + $0x5] sm:$0x1] %vm47_vm1, %v92_v32  ;;  %v109_v38 = vadd.f32 %v108_v37, %v106_v35  ;;  %v101_v39 = vadd.f32 %v100_v36, %v38_v9 }
  0x34   :  { %v110_v40 = vadd.f32 %v109_v38, %v38_v9  ;;  %102 = vst.msk [vmem:[#allocation2 + $0x6] sm:$0x1] %vm47_vm1, %v101_v39 }
  0x36   :  { %111 = vst.msk [vmem:[#allocation2 + $0x7] sm:$0x1] %vm47_vm1, %v110_v40 }
  0x3d   :  { %v112_v41 = vld [vmem:[#allocation2] sm:$0xff] }
  0x3e   :  { %353 = vmatmul.mubr.msk.f32.vlgmr.msra.gmra.mrb[0].mxu0 %vm124_vm2, %v112_v41 }
 0x111   :  { %v194_v49 = vpop.f32.mrb[0].mxu0 }
 0x112   :  { %v195_v50 = vadd.f32 %v330_v48, %v194_v49  ;;  %v354_v51 = vpop.f32.mrb[1].mxu0 }
 0x114   :  { %384 = vtanh.f32 %v195_v50 }
 0x11e   :  { %v385_v52 = vpop.eup %384 }
 0x11f   :  { %364 = vmatmul.mubr.msk.f32.vlgmr.msra.gmra.mrb[0].mxu1 %vm124_vm2, %v385_v52  ;;  %v283_v53 = vmul.f32 %v385_v52, %v385_v52 }
 0x121   :  { %v284_v54 = vsel %vm124_vm2, %v283_v53, 0.0 }
 0x122   :  { %285 = vadd.xlane.f32.xlu0 %v284_v54 }
 0x1af   :  { %v286_v59 = vpop.xlane.xlu0 %285 }
 0x1b0   :  { %v287_v60 = vmax.f32 %v286_v59, 1e-24 }
 0x1b2   :  { %386 = vrsqrt.f32 %v287_v60 }
 0x1bc   :  { %v387_v61 = vpop.eup %386 }
 0x1bd   :  { %v289_v62 = vmul.f32 %v387_v61, %v385_v52 }
 0x1f2   :  { %v279_v56 = vpop.f32.mrb[0].mxu1 }
 0x1f3   :  { %v280_v57 = vadd.f32 %v332_v55, %v279_v56  ;;  %v365_v58 = vpop.f32.mrb[1].mxu1 }
 0x1f5   :  { %291 = vrot.lane.b32.xlu0 %v280_v57, %s419_s12 }
 0x267   :  { %v292_v63 = vpop.permute.xlu0 %291 }
 0x268   :  { %v294_v0 = vsel %vm124_vm2, %v289_v62, %v292_v63 }
 0x269   :  { %295 = vst [vmem:[%s596_s16] sm:$0xff] %v294_v0 }

</bundles_post_ra>
